<compile_context>
chip_gen: v7x
topology: tpu7x:2x2x1
jax: 0.10.0
libtpu: 0.0.40
codegen_flags: <defaults>
</compile_context>

<pallas_src>
import math

import jax
import jax.numpy as jnp
import numpy as np
from jax.experimental import pallas as pl
from jax.experimental.pallas import tpu as pltpu


# ----------------------------------------------------------------------------
# DownSample as a single lane-dense MXU matmul Pallas kernel.
# ----------------------------------------------------------------------------
def _pool_matmul_kernel(x_ref, p_ref, o_ref):
    # (rows, q*W) @ (q*W, (q//kh)*Wo)  -> lane-dense pooled rows.
    o_ref[...] = jnp.dot(
        x_ref[...], p_ref[...],
        preferred_element_type=jnp.float32).astype(o_ref.dtype)


def _build_pool_matrix(q, W, kh, kw, dtype):
    """Static (q*W, (q//kh)*Wo) matrix implementing kh x kw average pooling on
    q H-rows folded into the lane axis.  For kw==2 and odd W the PyTorch
    replicate-pad of the last column is folded in (weight 1/kh on col W-1)."""
    Wo = W if kw == 1 else (W + 1) // 2
    P = np.zeros((q * W, (q // kh) * Wo), dtype=np.float64)
    for j in range(q):            # folded input H-row
        t = j // kh               # folded output H-row
        for wo in range(Wo):
            col = t * Wo + wo
            if kw == 1:
                P[j * W + wo, col] += 1.0 / kh
            else:
                w0 = 2 * wo
                w1 = min(2 * wo + 1, W - 1)   # replicate-pad clamp for odd W
                P[j * W + w0, col] += 0.5 / kh
                P[j * W + w1, col] += 0.5 / kh
    return jnp.asarray(P, dtype=dtype)


def _choose_fold(M, W, kh, lane_target=512, q_cap=128):
    """Largest q dividing M (even when kh==2) with q*W <= lane_target.
    lane_target=512 keeps the block-diagonal matmul's wasted MACs below the
    HBM roofline in f32 while making in/out lane widths >=128 when W permits."""
    q_min = 2 if kh == 2 else 1
    q_hi = max(q_min, min(q_cap, lane_target // max(W, 1)))
    for q in range(q_hi, q_min - 1, -1):
        if M % q == 0 and (kh == 1 or q % 2 == 0):
            return q
    return q_min


def _choose_block_rows(Mq, row_bytes, target_bytes=4 * 1024 * 1024):
    """~4 MiB input block per grid step; multiple of 8 rows (or full extent)."""
    if Mq <= 8:
        return Mq
    r = max(8, (target_bytes // max(row_bytes, 1)) // 8 * 8)
    return int(min(Mq, r))


def _avg_pool_pallas(x, kh, kw, *, block_rows=None):
    N, C, H, W = x.shape
    if kh == 2 and H % 2 != 0:
        # F.avg_pool2d floor semantics: the last row is dropped (rare edge).
        x = x[:, :, :H - 1, :]
        H = H - 1
    Ho = H // kh
    Wo = W if kw == 1 else (W + 1) // 2
    if H == 0:
        return jnp.zeros((N, C, 0, Wo), x.dtype)

    M = N * C * H                        # total H-rows (fused N*C*H axis)
    q = _choose_fold(M, W, kh)           # H-rows folded into the lane axis
    Mq = M // q
    in_w = q * W
    out_w = (q // kh) * Wo

    xf = x.reshape(Mq, in_w)             # free reshape (leading merge + fold)
    pmat = _build_pool_matrix(q, W, kh, kw, x.dtype)

    rb = block_rows if block_rows is not None else _choose_block_rows(
        Mq, in_w * x.dtype.itemsize)
    grid = (pl.cdiv(Mq, rb),)            # ragged last block handled by Pallas

    out = pl.pallas_call(
        _pool_matmul_kernel,
        out_shape=jax.ShapeDtypeStruct((Mq, out_w), x.dtype),
        grid_spec=pltpu.PrefetchScalarGridSpec(
            num_scalar_prefetch=0,
            grid=grid,
            in_specs=[
                pl.BlockSpec((rb, in_w), lambda g: (g, 0)),
                pl.BlockSpec((in_w, out_w), lambda g: (0, 0)),  # resident
            ],
            out_specs=pl.BlockSpec((rb, out_w), lambda g: (g, 0)),
        ),
        compiler_params=pltpu.CompilerParams(
            dimension_semantics=("parallel",),
            vmem_limit_bytes=32 * 1024 * 1024),
    )(xf, pmat)
    return out.reshape(N, C, Ho, Wo)     # free reshape back to NCHW


def downsample(x, layer_type, *, block_rows=None):
    """Forward pass of DownSample(layer_type) on NCHW input `x`."""
    if layer_type == 'none':
        return x
    elif layer_type == 'timepreserve':
        return _avg_pool_pallas(x, 2, 1, block_rows=block_rows)
    elif layer_type == 'channelpreserve':
        return _avg_pool_pallas(x, 1, 2, block_rows=block_rows)
    elif layer_type == 'half':
        return _avg_pool_pallas(x, 2, 2, block_rows=block_rows)
    else:
        raise RuntimeError(
            'Got unexpected donwsampletype %s, expected is '
            '[none, timepreserve, channelpreserve, half]' % layer_type)


# ----------------------------------------------------------------------------
# Pure-JAX reference (mirrors torch.nn.functional.avg_pool2d semantics).
# ----------------------------------------------------------------------------
def _ref_avg_pool(x, kh, kw):
    if kw == 2 and x.shape[-1] % 2 != 0:
        x = jnp.concatenate([x, x[..., -1:]], axis=-1)
    N, C, H, W = x.shape
    Ho, Wo = H // kh, W // kw
    x = x[:, :, :Ho * kh, :Wo * kw]
    x = x.reshape(N, C, Ho, kh, Wo, kw)
    return x.mean(axis=(3, 5))


def downsample_ref(x, layer_type):
    if layer_type == 'none':
        return x
    if layer_type == 'timepreserve':
        return _ref_avg_pool(x, 2, 1)
    if layer_type == 'channelpreserve':
        return _ref_avg_pool(x, 1, 2)
    if layer_type == 'half':
        return _ref_avg_pool(x, 2, 2)
    raise RuntimeError(layer_type)


# ----------------------------------------------------------------------------
# Discriminator2d forward (Pallas downsample inside every ResBlk shortcut).
# ----------------------------------------------------------------------------
def leaky_relu(x, slope=0.2):
    return jnp.where(x >= 0, x, slope * x)


def spectral_normalize(w, n_iter=3, eps=1e-12):
    """Approximate torch spectral_norm: w / sigma_max(w.reshape(out, -1))."""
    m = w.reshape(w.shape[0], -1).astype(jnp.float32)
    u = jnp.ones((m.shape[0],), jnp.float32) / jnp.sqrt(m.shape[0])
    v = m.T @ u
    for _ in range(n_iter):
        v = m.T @ u
        v = v / (jnp.linalg.norm(v) + eps)
        u = m @ v
        u = u / (jnp.linalg.norm(u) + eps)
    sigma = u @ (m @ v)
    return (w / sigma).astype(w.dtype)


def conv2d(x, w, b=None, stride=(1, 1), padding=(1, 1), groups=1):
    out = jax.lax.conv_general_dilated(
        x, w, window_strides=stride,
        padding=[(padding[0], padding[0]), (padding[1], padding[1])],
        dimension_numbers=('NCHW', 'OIHW', 'NCHW'),
        feature_group_count=groups)
    if b is not None:
        out = out + b.reshape(1, -1, 1, 1)
    return out


def _conv_init(key, cout, cin, kh, kw):
    scale = 1.0 / math.sqrt(cin * kh * kw)
    return scale * jax.random.normal(key, (cout, cin, kh, kw), jnp.float32)


def init_discriminator_params(key, dim_in=16, num_domains=2,
                              max_conv_dim=64, repeat_num=2):
    keys = iter(jax.random.split(key, 4 * repeat_num + 8))
    params = {
        'conv0_w': _conv_init(next(keys), dim_in, 1, 3, 3),
        'conv0_b': jnp.zeros((dim_in,), jnp.float32),
        'blocks': [],
    }
    d_in = dim_in
    for _ in range(repeat_num):
        d_out = min(d_in * 2, max_conv_dim)
        blk = {
            'conv1_w': _conv_init(next(keys), d_in, d_in, 3, 3),
            'conv1_b': jnp.zeros((d_in,), jnp.float32),
            'dres_w': _conv_init(next(keys), d_in, 1, 3, 3),   # depthwise
            'dres_b': jnp.zeros((d_in,), jnp.float32),
            'conv2_w': _conv_init(next(keys), d_out, d_in, 3, 3),
            'conv2_b': jnp.zeros((d_out,), jnp.float32),
        }
        if d_in != d_out:
            blk['conv1x1_w'] = _conv_init(next(keys), d_out, d_in, 1, 1)
        params['blocks'].append(blk)
        d_in = d_out
    params['conv5_w'] = _conv_init(next(keys), d_in, d_in, 5, 5)
    params['conv5_b'] = jnp.zeros((d_in,), jnp.float32)
    params['convf_w'] = _conv_init(next(keys), num_domains, d_in, 1, 1)
    params['convf_b'] = jnp.zeros((num_domains,), jnp.float32)
    return params


def resblk_forward(p, x):
    # shortcut
    s = x
    if 'conv1x1_w' in p:
        s = conv2d(s, spectral_normalize(p['conv1x1_w']), None, (1, 1), (0, 0))
    s = downsample(s, 'half')                      # <-- Pallas kernel
    # residual
    r = leaky_relu(x)
    r = conv2d(r, spectral_normalize(p['conv1_w']), p['conv1_b'], (1, 1), (1, 1))
    r = conv2d(r, spectral_normalize(p['dres_w']), p['dres_b'],
               (2, 2), (1, 1), groups=r.shape[1])  # LearnedDownSample 'half'
    r = leaky_relu(r)
    r = conv2d(r, spectral_normalize(p['conv2_w']), p['conv2_b'], (1, 1), (1, 1))
    return (s + r) / math.sqrt(2)


@jax.jit
def discriminator_forward(params, x):
    feats = []
    h = conv2d(x, spectral_normalize(params['conv0_w']), params['conv0_b'],
               (1, 1), (1, 1))
    feats.append(h)
    for blk in params['blocks']:
        h = resblk_forward(blk, h)
        feats.append(h)
    h = leaky_relu(h); feats.append(h)
    h = conv2d(h, spectral_normalize(params['conv5_w']), params['conv5_b'],
               (1, 1), (0, 0)); feats.append(h)
    h = leaky_relu(h); feats.append(h)
    h = jnp.mean(h, axis=(2, 3), keepdims=True); feats.append(h)  # AdaptiveAvgPool2d(1)
    h = conv2d(h, spectral_normalize(params['convf_w']), params['convf_b'],
               (1, 1), (0, 0)); feats.append(h)
    out = jnp.squeeze(h.reshape(h.shape[0], -1))
    return out, feats


# ----------------------------------------------------------------------------
if __name__ == "__main__":
    key = jax.random.PRNGKey(0)
    k1, k2, k3, k4 = jax.random.split(key, 4)
    ok = True

    # 1) DownSample kernel vs reference: even/odd W, even/odd H.
    test_shapes = [(2, 4, 16, 16), (2, 4, 16, 15), (2, 4, 15, 16)]
    for si, shp in enumerate(test_shapes):
        x = jax.random.normal(jax.random.fold_in(k1, si), shp, dtype=jnp.float32)
        for layer_type in ('none', 'timepreserve', 'channelpreserve', 'half'):
            out = jax.block_until_ready(downsample(x, layer_type))
            ref = downsample_ref(x, layer_type)
            if out.shape != ref.shape or not np.allclose(
                    np.asarray(out), np.asarray(ref), atol=1e-5, rtol=1e-5):
                ok = False
                print(f"MISMATCH layer_type={layer_type} shape={shp}")

    # 2) Multi-step grid with a ragged trailing block.
    xg = jax.random.normal(k2, (2, 16, 60, 48), dtype=jnp.float32)
    for layer_type in ('timepreserve', 'channelpreserve', 'half'):
        out = jax.block_until_ready(downsample(xg, layer_type, block_rows=80))
        ref = downsample_ref(xg, layer_type)
        if out.shape != ref.shape or not np.allclose(
                np.asarray(out), np.asarray(ref), atol=1e-5, rtol=1e-5):
            ok = False
            print(f"MISMATCH (ragged grid) layer_type={layer_type}")

    # 3) bf16 smoke test (MXU bf16 path).
    xb = jax.random.normal(k3, (2, 4, 16, 16), dtype=jnp.float32).astype(jnp.bfloat16)
    outb = jax.block_until_ready(downsample(xb, 'half'))
    refb = downsample_ref(xb.astype(jnp.float32), 'half')
    if outb.shape != refb.shape or not np.allclose(
            np.asarray(outb).astype(np.float32), np.asarray(refb),
            atol=1e-2, rtol=1e-2):
        ok = False
        print("MISMATCH bf16 half")

    # 4) Full Discriminator2d forward (small config), Pallas pool inside.
    params = init_discriminator_params(k4, dim_in=16, num_domains=2,
                                       max_conv_dim=64, repeat_num=2)
    xd = jax.random.normal(jax.random.fold_in(k4, 7), (2, 1, 32, 32),
                           dtype=jnp.float32)
    dout, feats = discriminator_forward(params, xd)
    dout = jax.block_until_ready(dout)
    if dout.shape != (2, 2) or not bool(jnp.all(jnp.isfinite(dout))):
        ok = False
        print(f"Discriminator2d forward failed: shape={dout.shape}")

    if ok:
        print("KERNEL_OK")
</pallas_src>

<mosaic_0001>
module attributes {stable_mosaic.version = 11 : i64} {
  func.func @_pool_matmul_kernel(%arg0: i32, %arg1: memref<4x512xf32, #tpu.memory_space<vmem>>, %arg2: memref<512x256xf32, #tpu.memory_space<vmem>>, %arg3: memref<4x256xf32, #tpu.memory_space<vmem>>) attributes {dimension_semantics = [#tpu.dimension_semantics<parallel>], iteration_bounds = array<i64: 1>, scalar_prefetch = 0 : i64, scratch_operands = 0 : i64, tpu.core_type = #tpu.core_type<tc>, window_params = [{transform_indices = @transform_0, window_bounds = array<i64: 4, 512>}, {pipeline_mode = #tpu.pipeline_mode<synchronous>, transform_indices = @transform_1, window_bounds = array<i64: 512, 256>}, {transform_indices = @transform_2, window_bounds = array<i64: 4, 256>}]} {
    %c0 = arith.constant 0 : index
    %c0_0 = arith.constant 0 : index
    %0 = vector.load %arg1[%c0, %c0_0] : memref<4x512xf32, #tpu.memory_space<vmem>>, vector<4x512xf32>
    %c0_1 = arith.constant 0 : index
    %c0_2 = arith.constant 0 : index
    %1 = vector.load %arg2[%c0_1, %c0_2] : memref<512x256xf32, #tpu.memory_space<vmem>>, vector<512x256xf32>
    %cst = arith.constant dense<0.000000e+00> : vector<4x256xf32>
    %2 = tpu.matmul %0, %1, %cst {dimension_numbers = #tpu.dot_dimension_numbers<[1], [0], [0], [1], [0, 0, 1, 1], [], []>} : vector<4x512xf32>, vector<512x256xf32>, vector<4x256xf32> -> vector<4x256xf32>
    %c0_3 = arith.constant 0 : index
    %c0_4 = arith.constant 0 : index
    %3 = vector.load %arg3[%c0_3, %c0_4] : memref<4x256xf32, #tpu.memory_space<vmem>>, vector<4x256xf32>
    tpu.vector_store %arg3[%c0_3, %c0_4], %2 {strides = array<i32>} : memref<4x256xf32, #tpu.memory_space<vmem>>, vector<4x256xf32>,
    return
  }
  func.func @transform_0(%arg0: i32) -> (i32, i32) {
    %c0_i32 = arith.constant 0 : i32
    %c0_i32_0 = arith.constant 0 : i32
    return %arg0, %c0_i32 : i32, i32
  }
  func.func @transform_1(%arg0: i32) -> (i32, i32) {
    %c0_i32 = arith.constant 0 : i32
    %c0_i32_0 = arith.constant 0 : i32
    %c0_i32_1 = arith.constant 0 : i32
    return %c0_i32, %c0_i32_0 : i32, i32
  }
  func.func @transform_2(%arg0: i32) -> (i32, i32) {
    %c0_i32 = arith.constant 0 : i32
    %c0_i32_0 = arith.constant 0 : i32
    return %arg0, %c0_i32 : i32, i32
  }
}

</mosaic_0001>

<bundles_post_ra>
// kernel: tpu_custom_call.1
= control target key start
LH: loop header
LB: loop body
LE: loop exit
PB: predicated region body
PF: predicated region fallthrough
CT: control target
= control target key end

     0   :  { %7 = vsyncpa [#allocation3], 0  ;;  %s619_s0 = inlined_call_operand.hbm [shape: f32[4,512], index: 0, kind: input, shape index: {}]   ;;  %s620_s1 = inlined_call_operand.hbm [shape: f32[512,256], index: 1, kind: input, shape index: {}]   ;;  %s621_s2 = inlined_call_operand.hbm [shape: f32[4,256], index: 2, kind: output, shape index: {}]  }
   0x1   :  { %8 = vsyncpa [#allocation6], 0 }
   0x2   :  { %9 = vsyncpa [#allocation4], 0  ;;  %s546_s9 = smov [#allocation2]   ;;  %s547_s11 = smov [#allocation5]  }
   0x3   :  { %s16_s10 = sshll.u32 %s546_s9, 4  ;;  %s25_s12 = sshll.u32 %s547_s11, 4  ;;  %s17_s10 = int_to_ptr.vmem [resolvable:$true] %s16_s10  ;;  %s566_s12 = int_to_ptr.vmem [resolvable:$true] %s25_s12 }
   0x4   :  { %s474_s15 = scalar_lea.hbm %s619_s0, 256 }
   0x5   :  { %p475_p0 = scmp.ne.s32.totalorder %s619_s0, %s474_s15  ;;  %p478_p1 = scmp.lt.u32.totalorder %s474_s15, %s619_s0 }
   0x7   :  { %p480_p2 = pnand %p478_p1, %p475_p0 }
   0x9   :  { %483 = shalt.err (!%p480_p2)
}
   0xa   :  { %s484_s20 = scalar_lea.vmem %s17_s10, 256  ;;  %p489_p4 = scmp.lt.s32.totalorder %s17_s10, %s17_s10 }
   0xb   :  { %p485_p3 = scmp.ne.s32.totalorder %s17_s10, %s484_s20  ;;  %p490_p5 = scmp.lt.s32.totalorder %s484_s20, %s484_s20 }
   0xd   :  { %p491_p6 = por %p490_p5, %p489_p4 }
   0xf   :  { %p492_p7 = pnand %p491_p6, %p485_p3 }
  0x11   :  { %495 = shalt.err (!%p492_p7)
}
  0x12   :  { %19 = dma.hbm_to_vmem [thread:$0]  %s619_s0, 256, %s17_s10, [#allocation3]  }
  0x13   :  { %s496_s25 = scalar_lea.hbm %s620_s1, 16384 }
  0x14   :  { %p497_p8 = scmp.ne.s32.totalorder %s620_s1, %s496_s25  ;;  %p500_p9 = scmp.lt.u32.totalorder %s496_s25, %s620_s1 }
  0x16   :  { %p502_p10 = pnand %p500_p9, %p497_p8 }
  0x18   :  { %505 = shalt.err (!%p502_p10)
}
  0x19   :  { %s506_s30 = scalar_lea.vmem %s566_s12, 16384  ;;  %p511_p12 = scmp.lt.s32.totalorder %s566_s12, %s566_s12 }
  0x1a   :  { %p507_p11 = scmp.ne.s32.totalorder %s566_s12, %s506_s30  ;;  %p512_p13 = scmp.lt.s32.totalorder %s506_s30, %s506_s30 }
  0x1c   :  { %p513_p0 = por %p512_p13, %p511_p12 }
  0x1e   :  { %p514_p1 = pnand %p513_p0, %p507_p11 }
  0x20   :  { %517 = shalt.err (!%p514_p1)
}
  0x21   :  { %s548_s0 = smov 256   ;;  %s549_s3 = smov 16  }
  0x22   :  { %31 = dma.hbm_to_vmem [thread:$0]  %s620_s1, 16384, %s566_s12, [#allocation6], %s548_s0, %s548_s0, %s549_s3  }
  0x23   :  { %540 = dma.done.wait [#allocation3], 256  }
  0x24   :  { %541 = vsyncadd [#allocation3], 4294967040 }
  0x25   :  { %542 = dma.done.wait [#allocation6], 16384  }
  0x26   :  { %543 = vsyncadd [#allocation6], 4294950912  ;;  %v41_v0 = vld [vmem:[#allocation5 + $0x8] sm:$0xff]  ;;  %v43_v1 = vld [vmem:[#allocation5 + $0x18] sm:$0xff]  ;;  %s550_s1 = smov [#allocation7]  }
  0x27   :  { %v105_v2 = vld [vmem:[#allocation5 + $0x208] sm:$0xff]  ;;  %v337_v3 = vpack.c.bf16 %v43_v1, %v41_v0  ;;  %v107_v4 = vld [vmem:[#allocation5 + $0x218] sm:$0xff]  ;;  %v40_v5 = vld [vmem:[#allocation5] sm:$0xff]  ;;  %s327_s6 = sshll.u32 %s550_s1, 4  ;;  %s328_s6 = int_to_ptr.vmem [resolvable:$true] %s327_s6 }
  0x28   :  { %v42_v6 = vld [vmem:[#allocation5 + $0x10] sm:$0xff]  ;;  %v401_v7 = vpack.c.bf16 %v107_v4, %v105_v2  ;;  %v104_v9 = vld [vmem:[#allocation5 + $0x200] sm:$0xff]  ;;  %v45_v11 = vld [vmem:[#allocation5 + $0x28] sm:$0xff]  ;;  %s518_s7 = scalar_lea.vmem %s328_s6, 128  ;;  %p523_p3 = scmp.lt.s32.totalorder %s328_s6, %s328_s6 }
  0x29   :  { %v339_v8 = vpack.c.bf16 %v42_v6, %v40_v5  ;;  %v106_v10 = vld [vmem:[#allocation5 + $0x210] sm:$0xff]  ;;  %338 = vmatprep.subr.bf16.mxu1 %v337_v3  ;;  %v47_v13 = vld [vmem:[#allocation5 + $0x38] sm:$0xff]  ;;  %v109_v14 = vld [vmem:[#allocation5 + $0x228] sm:$0xff]  ;;  %p519_p2 = scmp.ne.s32.totalorder %s328_s6, %s518_s7  ;;  %p524_p4 = scmp.lt.s32.totalorder %s518_s7, %s518_s7 }
  0x2a   :  { %v403_v12 = vpack.c.bf16 %v106_v10, %v104_v9  ;;  %v111_v15 = vld [vmem:[#allocation5 + $0x238] sm:$0xff]  ;;  %402 = vmatprep.subr.bf16.mxu0 %v401_v7  ;;  %v341_v16 = vpack.c.bf16 %v47_v13, %v45_v11  ;;  %v44_v18 = vld [vmem:[#allocation5 + $0x20] sm:$0xff]  ;;  %v46_v19 = vld [vmem:[#allocation5 + $0x30] sm:$0xff] }
  0x2b   :  { %340 = vmatpush1.bf16.msra.mxu1 %v339_v8  ;;  %v405_v17 = vpack.c.bf16 %v111_v15, %v109_v14  ;;  %v108_v20 = vld [vmem:[#allocation5 + $0x220] sm:$0xff]  ;;  %v343_v21 = vpack.c.bf16 %v46_v19, %v44_v18  ;;  %v110_v22 = vld [vmem:[#allocation5 + $0x230] sm:$0xff]  ;;  %v49_v23 = vld [vmem:[#allocation5 + $0x48] sm:$0xff]  ;;  %p525_p5 = por %p524_p4, %p523_p3 }
  0x2c   :  { %404 = vmatpush1.bf16.msra.mxu0 %v403_v12  ;;  %v51_v24 = vld [vmem:[#allocation5 + $0x58] sm:$0xff]  ;;  %342 = vmatprep.subr.bf16.mxu1 %v341_v16  ;;  %v407_v25 = vpack.c.bf16 %v110_v22, %v108_v20  ;;  %v113_v27 = vld [vmem:[#allocation5 + $0x248] sm:$0xff]  ;;  %v48_v29 = vld [vmem:[#allocation5 + $0x40] sm:$0xff] }
  0x2d   :  { %406 = vmatprep.subr.bf16.mxu0 %v405_v17  ;;  %v345_v26 = vpack.c.bf16 %v51_v24, %v49_v23  ;;  %v115_v28 = vld [vmem:[#allocation5 + $0x258] sm:$0xff]  ;;  %v50_v31 = vld [vmem:[#allocation5 + $0x50] sm:$0xff]  ;;  %v112_v32 = vld [vmem:[#allocation5 + $0x240] sm:$0xff]  ;;  %p526_p6 = pnand %p525_p5, %p519_p2 }
  0x2e   :  { %v409_v30 = vpack.c.bf16 %v115_v28, %v113_v27  ;;  %v114_v33 = vld [vmem:[#allocation5 + $0x250] sm:$0xff]  ;;  %v347_v34 = vpack.c.bf16 %v50_v31, %v48_v29  ;;  %v53_v35 = vld [vmem:[#allocation5 + $0x68] sm:$0xff]  ;;  %v55_v36 = vld [vmem:[#allocation5 + $0x78] sm:$0xff] }
  0x2f   :  { %344 = vmatpush1.bf16.msra.mxu1 %v343_v21  ;;  %v117_v37 = vld [vmem:[#allocation5 + $0x268] sm:$0xff]  ;;  %v411_v38 = vpack.c.bf16 %v114_v33, %v112_v32  ;;  %v349_v39 = vpack.c.bf16 %v55_v36, %v53_v35  ;;  %v119_v40 = vld [vmem:[#allocation5 + $0x278] sm:$0xff]  ;;  %v52_v41 = vld [vmem:[#allocation5 + $0x60] sm:$0xff] }
  0x30   :  { %408 = vmatpush1.bf16.msra.mxu0 %v407_v25  ;;  %346 = vmatprep.subr.bf16.mxu1 %v345_v26  ;;  %v54_v42 = vld [vmem:[#allocation5 + $0x70] sm:$0xff]  ;;  %v413_v43 = vpack.c.bf16 %v119_v40, %v117_v37  ;;  %v116_v44 = vld [vmem:[#allocation5 + $0x260] sm:$0xff]  ;;  %v57_v46 = vld [vmem:[#allocation5 + $0x88] sm:$0xff] }
  0x31   :  { %410 = vmatprep.subr.bf16.mxu0 %v409_v30  ;;  %v118_v45 = vld [vmem:[#allocation5 + $0x270] sm:$0xff]  ;;  %v59_v47 = vld [vmem:[#allocation5 + $0x98] sm:$0xff]  ;;  %v121_v48 = vld [vmem:[#allocation5 + $0x288] sm:$0xff]  ;;  %v351_v50 = vpack.c.bf16 %v54_v42, %v52_v41 }
  0x32   :  { %v123_v49 = vld [vmem:[#allocation5 + $0x298] sm:$0xff]  ;;  %v415_v51 = vpack.c.bf16 %v118_v45, %v116_v44  ;;  %v353_v52 = vpack.c.bf16 %v59_v47, %v57_v46  ;;  %v56_v53 = vld [vmem:[#allocation5 + $0x80] sm:$0xff]  ;;  %v58_v54 = vld [vmem:[#allocation5 + $0x90] sm:$0xff] }
  0x33   :  { %348 = vmatpush1.bf16.msra.mxu1 %v347_v34  ;;  %v120_v55 = vld [vmem:[#allocation5 + $0x280] sm:$0xff]  ;;  %v417_v56 = vpack.c.bf16 %v123_v49, %v121_v48  ;;  %v122_v57 = vld [vmem:[#allocation5 + $0x290] sm:$0xff]  ;;  %v61_v58 = vld [vmem:[#allocation5 + $0xa8] sm:$0xff]  ;;  %v355_v62 = vpack.c.bf16 %v58_v54, %v56_v53 }
  0x34   :  { %412 = vmatpush1.bf16.msra.mxu0 %v411_v38  ;;  %350 = vmatprep.subr.bf16.mxu1 %v349_v39  ;;  %v63_v59 = vld [vmem:[#allocation5 + $0xb8] sm:$0xff]  ;;  %v125_v60 = vld [vmem:[#allocation5 + $0x2a8] sm:$0xff]  ;;  %v419_v63 = vpack.c.bf16 %v122_v57, %v120_v55  ;;  %v60_v1 = vld [vmem:[#allocation5 + $0xa0] sm:$0xff] }
  0x35   :  { %414 = vmatprep.subr.bf16.mxu0 %v413_v43  ;;  %v127_v61 = vld [vmem:[#allocation5 + $0x2b8] sm:$0xff]  ;;  %v357_v0 = vpack.c.bf16 %v63_v59, %v61_v58  ;;  %v62_v2 = vld [vmem:[#allocation5 + $0xb0] sm:$0xff]  ;;  %v124_v3 = vld [vmem:[#allocation5 + $0x2a0] sm:$0xff] }
  0x36   :  { %v421_v4 = vpack.c.bf16 %v127_v61, %v125_v60  ;;  %v126_v5 = vld [vmem:[#allocation5 + $0x2b0] sm:$0xff]  ;;  %v65_v6 = vld [vmem:[#allocation5 + $0xc8] sm:$0xff]  ;;  %v67_v7 = vld [vmem:[#allocation5 + $0xd8] sm:$0xff]  ;;  %v359_v10 = vpack.c.bf16 %v62_v2, %v60_v1 }
  0x37   :  { %352 = vmatpush1.bf16.msra.mxu1 %v351_v50  ;;  %v129_v8 = vld [vmem:[#allocation5 + $0x2c8] sm:$0xff]  ;;  %v131_v9 = vld [vmem:[#allocation5 + $0x2d8] sm:$0xff]  ;;  %v423_v11 = vpack.c.bf16 %v126_v5, %v124_v3  ;;  %v361_v12 = vpack.c.bf16 %v67_v7, %v65_v6  ;;  %v64_v13 = vld [vmem:[#allocation5 + $0xc0] sm:$0xff] }
  0x38   :  { %416 = vmatpush1.bf16.msra.mxu0 %v415_v51  ;;  %354 = vmatprep.subr.bf16.mxu1 %v353_v52  ;;  %v66_v14 = vld [vmem:[#allocation5 + $0xd0] sm:$0xff]  ;;  %v128_v15 = vld [vmem:[#allocation5 + $0x2c0] sm:$0xff]  ;;  %v425_v16 = vpack.c.bf16 %v131_v9, %v129_v8  ;;  %v69_v18 = vld [vmem:[#allocation5 + $0xe8] sm:$0xff] }
  0x39   :  { %418 = vmatprep.subr.bf16.mxu0 %v417_v56  ;;  %v130_v17 = vld [vmem:[#allocation5 + $0x2d0] sm:$0xff]  ;;  %v71_v19 = vld [vmem:[#allocation5 + $0xf8] sm:$0xff]  ;;  %v133_v20 = vld [vmem:[#allocation5 + $0x2e8] sm:$0xff]  ;;  %v363_v22 = vpack.c.bf16 %v66_v14, %v64_v13 }
  0x3a   :  { %v135_v21 = vld [vmem:[#allocation5 + $0x2f8] sm:$0xff]  ;;  %v427_v23 = vpack.c.bf16 %v130_v17, %v128_v15  ;;  %v365_v24 = vpack.c.bf16 %v71_v19, %v69_v18  ;;  %v68_v25 = vld [vmem:[#allocation5 + $0xe0] sm:$0xff]  ;;  %v70_v26 = vld [vmem:[#allocation5 + $0xf0] sm:$0xff] }
  0x3b   :  { %356 = vmatpush1.bf16.msra.mxu1 %v355_v62  ;;  %v132_v27 = vld [vmem:[#allocation5 + $0x2e0] sm:$0xff]  ;;  %v429_v28 = vpack.c.bf16 %v135_v21, %v133_v20  ;;  %v134_v29 = vld [vmem:[#allocation5 + $0x2f0] sm:$0xff]  ;;  %v73_v30 = vld [vmem:[#allocation5 + $0x108] sm:$0xff]  ;;  %v367_v34 = vpack.c.bf16 %v70_v26, %v68_v25 }
  0x3c   :  { %420 = vmatpush1.bf16.msra.mxu0 %v419_v63  ;;  %358 = vmatprep.subr.bf16.mxu1 %v357_v0  ;;  %v75_v31 = vld [vmem:[#allocation5 + $0x118] sm:$0xff]  ;;  %v137_v32 = vld [vmem:[#allocation5 + $0x308] sm:$0xff]  ;;  %v431_v35 = vpack.c.bf16 %v134_v29, %v132_v27  ;;  %v72_v37 = vld [vmem:[#allocation5 + $0x100] sm:$0xff] }
  0x3d   :  { %422 = vmatprep.subr.bf16.mxu0 %v421_v4  ;;  %v139_v33 = vld [vmem:[#allocation5 + $0x318] sm:$0xff]  ;;  %v369_v36 = vpack.c.bf16 %v75_v31, %v73_v30  ;;  %v74_v38 = vld [vmem:[#allocation5 + $0x110] sm:$0xff]  ;;  %v136_v39 = vld [vmem:[#allocation5 + $0x300] sm:$0xff] }
  0x3e   :  { %v433_v40 = vpack.c.bf16 %v139_v33, %v137_v32  ;;  %v138_v41 = vld [vmem:[#allocation5 + $0x310] sm:$0xff]  ;;  %v77_v42 = vld [vmem:[#allocation5 + $0x128] sm:$0xff]  ;;  %v79_v43 = vld [vmem:[#allocation5 + $0x138] sm:$0xff]  ;;  %v371_v46 = vpack.c.bf16 %v74_v38, %v72_v37 }
  0x3f   :  { %360 = vmatpush1.bf16.msra.mxu1 %v359_v10  ;;  %v141_v44 = vld [vmem:[#allocation5 + $0x328] sm:$0xff]  ;;  %v143_v45 = vld [vmem:[#allocation5 + $0x338] sm:$0xff]  ;;  %v435_v47 = vpack.c.bf16 %v138_v41, %v136_v39  ;;  %v373_v48 = vpack.c.bf16 %v79_v43, %v77_v42  ;;  %v76_v49 = vld [vmem:[#allocation5 + $0x120] sm:$0xff] }
  0x40   :  { %424 = vmatpush1.bf16.msra.mxu0 %v423_v11  ;;  %362 = vmatprep.subr.bf16.mxu1 %v361_v12  ;;  %v78_v50 = vld [vmem:[#allocation5 + $0x130] sm:$0xff]  ;;  %v140_v51 = vld [vmem:[#allocation5 + $0x320] sm:$0xff]  ;;  %v437_v52 = vpack.c.bf16 %v143_v45, %v141_v44  ;;  %v81_v54 = vld [vmem:[#allocation5 + $0x148] sm:$0xff] }
  0x41   :  { %426 = vmatprep.subr.bf16.mxu0 %v425_v16  ;;  %v142_v53 = vld [vmem:[#allocation5 + $0x330] sm:$0xff]  ;;  %v83_v55 = vld [vmem:[#allocation5 + $0x158] sm:$0xff]  ;;  %v145_v56 = vld [vmem:[#allocation5 + $0x348] sm:$0xff]  ;;  %v375_v58 = vpack.c.bf16 %v78_v50, %v76_v49 }
  0x42   :  { %v147_v57 = vld [vmem:[#allocation5 + $0x358] sm:$0xff]  ;;  %v439_v59 = vpack.c.bf16 %v142_v53, %v140_v51  ;;  %v377_v60 = vpack.c.bf16 %v83_v55, %v81_v54  ;;  %v80_v61 = vld [vmem:[#allocation5 + $0x140] sm:$0xff]  ;;  %v82_v62 = vld [vmem:[#allocation5 + $0x150] sm:$0xff] }
  0x43   :  { %364 = vmatpush1.bf16.msra.mxu1 %v363_v22  ;;  %v144_v63 = vld [vmem:[#allocation5 + $0x340] sm:$0xff]  ;;  %v441_v0 = vpack.c.bf16 %v147_v57, %v145_v56  ;;  %v146_v1 = vld [vmem:[#allocation5 + $0x350] sm:$0xff]  ;;  %v85_v2 = vld [vmem:[#allocation5 + $0x168] sm:$0xff]  ;;  %v379_v6 = vpack.c.bf16 %v82_v62, %v80_v61 }
  0x44   :  { %428 = vmatpush1.bf16.msra.mxu0 %v427_v23  ;;  %366 = vmatprep.subr.bf16.mxu1 %v365_v24  ;;  %v87_v3 = vld [vmem:[#allocation5 + $0x178] sm:$0xff]  ;;  %v149_v4 = vld [vmem:[#allocation5 + $0x368] sm:$0xff]  ;;  %v84_v7 = vld [vmem:[#allocation5 + $0x160] sm:$0xff]  ;;  %v443_v8 = vpack.c.bf16 %v146_v1, %v144_v63 }
  0x45   :  { %430 = vmatprep.subr.bf16.mxu0 %v429_v28  ;;  %v151_v5 = vld [vmem:[#allocation5 + $0x378] sm:$0xff]  ;;  %v381_v9 = vpack.c.bf16 %v87_v3, %v85_v2  ;;  %v86_v10 = vld [vmem:[#allocation5 + $0x170] sm:$0xff]  ;;  %v148_v11 = vld [vmem:[#allocation5 + $0x360] sm:$0xff] }
  0x46   :  { %v150_v12 = vld [vmem:[#allocation5 + $0x370] sm:$0xff]  ;;  %v445_v13 = vpack.c.bf16 %v151_v5, %v149_v4  ;;  %v89_v14 = vld [vmem:[#allocation5 + $0x188] sm:$0xff]  ;;  %v91_v15 = vld [vmem:[#allocation5 + $0x198] sm:$0xff]  ;;  %v383_v21 = vpack.c.bf16 %v86_v10, %v84_v7 }
  0x47   :  { %368 = vmatpush1.bf16.msra.mxu1 %v367_v34  ;;  %v597_v16 = vld [vmem:[#allocation2] sm:$0xff]  ;;  %v153_v17 = vld [vmem:[#allocation5 + $0x388] sm:$0xff]  ;;  %v155_v18 = vld [vmem:[#allocation5 + $0x398] sm:$0xff]  ;;  %v447_v23 = vpack.c.bf16 %v150_v12, %v148_v11  ;;  %v385_v24 = vpack.c.bf16 %v91_v15, %v89_v14 }
  0x48   :  { %432 = vmatpush1.bf16.msra.mxu0 %v431_v35  ;;  %370 = vmatprep.subr.bf16.mxu1 %v369_v36  ;;  %v170_v19 = vcombine.high %v597_v16, %v597_v16  ;;  %v601_v20 = vld [vmem:[#allocation2 + $0x8] sm:$0xff]  ;;  %v88_v25 = vld [vmem:[#allocation5 + $0x180] sm:$0xff]  ;;  %v90_v26 = vld [vmem:[#allocation5 + $0x190] sm:$0xff]  ;;  %v449_v28 = vpack.c.bf16 %v155_v18, %v153_v17 }
  0x49   :  { %434 = vmatprep.subr.bf16.mxu0 %v433_v40  ;;  %v171_v22 = vcombine.high %v601_v20, %v601_v20  ;;  %v152_v27 = vld [vmem:[#allocation5 + $0x380] sm:$0xff]  ;;  %v154_v29 = vld [vmem:[#allocation5 + $0x390] sm:$0xff]  ;;  %v93_v30 = vld [vmem:[#allocation5 + $0x1a8] sm:$0xff]  ;;  %v387_v34 = vpack.c.bf16 %v90_v26, %v88_v25 }
  0x4a   :  { %v95_v31 = vld [vmem:[#allocation5 + $0x1b8] sm:$0xff]  ;;  %238 = vmatprep.mubr.f32.mxu1 %v170_v19  ;;  %v157_v32 = vld [vmem:[#allocation5 + $0x3a8] sm:$0xff]  ;;  %v451_v35 = vpack.c.bf16 %v154_v29, %v152_v27  ;;  %v92_v37 = vld [vmem:[#allocation5 + $0x1a0] sm:$0xff] }
  0x4b   :  { %372 = vmatpush1.bf16.msra.mxu1 %v371_v46  ;;  %v159_v33 = vld [vmem:[#allocation5 + $0x3b8] sm:$0xff]  ;;  %309 = vmatprep.mubr.f32.mxu0 %v171_v22  ;;  %v389_v36 = vpack.c.bf16 %v95_v31, %v93_v30  ;;  %v94_v38 = vld [vmem:[#allocation5 + $0x1b0] sm:$0xff]  ;;  %v156_v39 = vld [vmem:[#allocation5 + $0x3a0] sm:$0xff] }
  0x4c   :  { %436 = vmatpush1.bf16.msra.mxu0 %v435_v47  ;;  %374 = vmatprep.subr.bf16.mxu1 %v373_v48  ;;  %v453_v40 = vpack.c.bf16 %v159_v33, %v157_v32  ;;  %v158_v41 = vld [vmem:[#allocation5 + $0x3b0] sm:$0xff]  ;;  %v97_v42 = vld [vmem:[#allocation5 + $0x1c8] sm:$0xff]  ;;  %v99_v43 = vld [vmem:[#allocation5 + $0x1d8] sm:$0xff]  ;;  %v391_v46 = vpack.c.bf16 %v94_v38, %v92_v37 }
  0x4d   :  { %438 = vmatprep.subr.bf16.mxu0 %v437_v52  ;;  %v161_v44 = vld [vmem:[#allocation5 + $0x3c8] sm:$0xff]  ;;  %v163_v45 = vld [vmem:[#allocation5 + $0x3d8] sm:$0xff]  ;;  %v455_v47 = vpack.c.bf16 %v158_v41, %v156_v39  ;;  %v393_v48 = vpack.c.bf16 %v99_v43, %v97_v42  ;;  %v96_v49 = vld [vmem:[#allocation5 + $0x1c0] sm:$0xff] }
  0x4e   :  { %v98_v50 = vld [vmem:[#allocation5 + $0x1d0] sm:$0xff]  ;;  %v160_v51 = vld [vmem:[#allocation5 + $0x3c0] sm:$0xff]  ;;  %v457_v52 = vpack.c.bf16 %v163_v45, %v161_v44  ;;  %v101_v54 = vld [vmem:[#allocation5 + $0x1e8] sm:$0xff] }
  0x4f   :  { %376 = vmatpush1.bf16.msra.mxu1 %v375_v58  ;;  %v162_v53 = vld [vmem:[#allocation5 + $0x3d0] sm:$0xff]  ;;  %v103_v55 = vld [vmem:[#allocation5 + $0x1f8] sm:$0xff]  ;;  %v165_v56 = vld [vmem:[#allocation5 + $0x3e8] sm:$0xff]  ;;  %v395_v58 = vpack.c.bf16 %v98_v50, %v96_v49 }
  0x50   :  { %440 = vmatpush1.bf16.msra.mxu0 %v439_v59  ;;  %378 = vmatprep.subr.bf16.mxu1 %v377_v60  ;;  %v167_v57 = vld [vmem:[#allocation5 + $0x3f8] sm:$0xff]  ;;  %v459_v59 = vpack.c.bf16 %v162_v53, %v160_v51  ;;  %v397_v60 = vpack.c.bf16 %v103_v55, %v101_v54  ;;  %v100_v61 = vld [vmem:[#allocation5 + $0x1e0] sm:$0xff]  ;;  %v102_v62 = vld [vmem:[#allocation5 + $0x1f0] sm:$0xff] }
  0x51   :  { %442 = vmatprep.subr.bf16.mxu0 %v441_v0  ;;  %v461_v63 = vpack.c.bf16 %v167_v57, %v165_v56  ;;  %v164_v0 = vld [vmem:[#allocation5 + $0x3e0] sm:$0xff]  ;;  %v166_v1 = vld [vmem:[#allocation5 + $0x3f0] sm:$0xff]  ;;  %v399_v2 = vpack.c.bf16 %v102_v62, %v100_v61 }
  0x52   :  { %v463_v3 = vpack.c.bf16 %v166_v1, %v164_v0 }
  0x53   :  { %380 = vmatpush1.bf16.msra.mxu1 %v379_v6 }
  0x54   :  { %444 = vmatpush1.bf16.msra.mxu0 %v443_v8  ;;  %382 = vmatprep.subr.bf16.mxu1 %v381_v9 }
  0x55   :  { %446 = vmatprep.subr.bf16.mxu0 %v445_v13 }
  0x57   :  { %384 = vmatpush1.bf16.msra.mxu1 %v383_v21 }
  0x58   :  { %448 = vmatpush1.bf16.msra.mxu0 %v447_v23  ;;  %386 = vmatprep.subr.bf16.mxu1 %v385_v24 }
  0x59   :  { %450 = vmatprep.subr.bf16.mxu0 %v449_v28 }
  0x5b   :  { %388 = vmatpush1.bf16.msra.mxu1 %v387_v34 }
  0x5c   :  { %452 = vmatpush1.bf16.msra.mxu0 %v451_v35  ;;  %390 = vmatprep.subr.bf16.mxu1 %v389_v36 }
  0x5d   :  { %454 = vmatprep.subr.bf16.mxu0 %v453_v40 }
  0x5f   :  { %392 = vmatpush1.bf16.msra.mxu1 %v391_v46 }
  0x60   :  { %456 = vmatpush1.bf16.msra.mxu0 %v455_v47  ;;  %394 = vmatprep.subr.bf16.mxu1 %v393_v48 }
  0x61   :  { %458 = vmatprep.subr.bf16.mxu0 %v457_v52 }
  0x63   :  { %396 = vmatpush1.bf16.msra.mxu1 %v395_v58 }
  0x64   :  { %460 = vmatpush1.bf16.msra.mxu0 %v459_v59  ;;  %398 = vmatprep.subr.bf16.mxu1 %v397_v60 }
  0x65   :  { %462 = vmatprep.subr.bf16.mxu0 %v461_v63 }
  0x67   :  { %400 = vmatpush1.bf16.msra.mxu1 %v399_v2 }
  0x68   :  { %464 = vmatpush1.bf16.msra.mxu0 %v463_v3 }
  0x6a   :  { %239 = vmatmul.mubr.f32.vlgmr.msra.gmra.mrb[0].mxu1 %v597_v16 }
  0x6b   :  { %310 = vmatmul.mubr.f32.vlgmr.msra.gmra.mrb[0].mxu0 %v601_v20 }
 0x13d   :  { %v240_v4 = vpop.f32.mrb[0].mxu1 }
 0x13e   :  { %v311_v5 = vpop.f32.mrb[0].mxu0  ;;  %v242_v6 = vpop.f32.mrb[1].mxu1 }
 0x13f   :  { %v312_v7 = vadd.f32 %v311_v5, %v240_v4  ;;  %v313_v8 = vpop.f32.mrb[1].mxu0 }
 0x140   :  { %v314_v9 = vadd.f32 %v313_v8, %v242_v6 }
 0x142   :  { %v318_v10 = vcombine.low %v312_v7, %v314_v9 }
 0x144   :  { %320 = vst [vmem:[#allocation7] sm:$0xff] %v318_v10 }
 0x145   :  { %529 = shalt.err (!%p526_p6)
}
 0x146   :  { %s530_s10 = scalar_lea.hbm %s621_s2, 128 }
 0x147   :  { %p531_p7 = scmp.ne.s32.totalorder %s621_s2, %s530_s10  ;;  %p534_p8 = scmp.lt.u32.totalorder %s530_s10, %s621_s2 }
 0x149   :  { %p536_p9 = pnand %p534_p8, %p531_p7 }
 0x14b   :  { %539 = shalt.err (!%p536_p9)
}
 0x14c   :  { %330 = dma.vmem_to_hbm [thread:$0]  %s328_s6, 128, %s621_s2, [#allocation4]  }
 0x14d   :  { %544 = dma.done.wait [#allocation4], 128  }
 0x14e   :  { %545 = vsyncadd [#allocation4], 4294967168 }
 0x14f   :  { %334 = vsyncpa [#allocation3], 1 }
 0x150   :  { %335 = vsyncpa [#allocation6], 1 }
 0x151   :  { %336 = vsyncpa [#allocation4], 1 }

</bundles_post_ra>
